<compile_context>
chip_gen: v6e
topology: v6e:2x2x1
jax: 0.10.0
libtpu: 0.0.40
codegen_flags: <defaults>
</compile_context>

<pallas_src>
from functools import partial

import jax
import jax.numpy as jnp
from jax.experimental import pallas as pl
from jax.experimental.pallas import tpu as pltpu


def _pt_scan_kernel(x_ref, wn_ref, bn_ref, o_ref, *, inv_postroot, apply_root,
                    log_space):
    # x_ref:  (P, F, Bt)  features on sublanes, batch on lanes (fully dense).
    # wn_ref: (P, F, 1)   = -scale * w   (lane-broadcast, VMEM-resident)
    # bn_ref: (P, F, 1)   = -scale * b
    # o_ref:  (P, Bt)     lane-dense output block.
    F = x_ref.shape[1]
    v = x_ref[...] * wn_ref[...] + bn_ref[...]       # = -scale*(x*w + b)   (VPU)
    d = jnp.exp(v) + 1.0                             # d_f = 1/sigmoid(u_f) (EUP+VPU)
    if log_space:
        # Opt-in path for very large F where prod_f d_f could overflow f32.
        s = jnp.sum(jnp.log(d), axis=1)              # sublane reduce -> (P, Bt)
        res = jnp.exp(-inv_postroot * s)
    else:
        prod = d[:, 0, :]
        for f in range(1, F):                        # static unroll; lane-dense muls
            prod = prod * d[:, f, :]
        if apply_root:
            res = jnp.exp(-inv_postroot * jnp.log(prod))
        else:
            res = 1.0 / prod                         # prod_f sigmoid(u_f)
    o_ref[...] = res.astype(o_ref.dtype)


def _pick_batch_tile(P, F, B, itemsize=4):
    """Largest lane-dense batch tile that fits a conservative VMEM budget."""
    # Budget keeps (3-deep x buffers + 2-deep out buffers + resident params)
    # well under the 32 MiB scoped-VMEM default on every generation, including
    # v7x (64 MiB physical VMEM).
    VMEM_BUDGET = 20 * 1024 * 1024
    if B <= 128:
        return B                       # single block; block == full dim is legal
    per_batch = (3 * P * F + 2 * P) * itemsize
    bt = max(128, min(8192, VMEM_BUDGET // per_batch) // 128 * 128)
    if B >= 256:
        # v7x has 2 TensorCores: keep at least two parallel grid steps.
        bt = min(bt, (B // 2) // 128 * 128)
    bt = min(bt, pl.cdiv(B, 128) * 128)
    while bt > 128 and B % bt:
        bt -= 128                      # prefer an exact divisor of B
    return bt


def pt_scan_forward(x_fb, weights, biases, *, activationscale=2.0, postroot=1.0,
                    log_space=False):
    """Fused PtScanNetwork forward (all pt nets in one kernel).

    Args:
      x_fb:    (P, F, B) inputs, feature-major / batch-minor.  Preferred layout:
               producing it upstream is free and avoids an extra HBM relayout.
      weights: (P, F) per-net per-feature weights.
      biases:  (P, F) per-net per-feature biases.
    Returns:
      (P, B) array; row i equals OneToOneLinear_i(x[i]) of the PyTorch module.
    """
    assert postroot != 0.0, "post_product_root must be nonzero"
    P, F, B = x_fb.shape
    assert weights.shape == (P, F) and biases.shape == (P, F)

    # Fold the activation scale (and the minus sign used by the exp(-u)
    # formulation) into the parameters: kernel computes v = x*wn + bn = -scale*(x*w+b).
    scale = float(activationscale)
    wn = (-scale * weights)[..., None].astype(x_fb.dtype)      # (P, F, 1)
    bn = (-scale * biases)[..., None].astype(x_fb.dtype)       # (P, F, 1)

    bt = _pick_batch_tile(P, F, B, jnp.dtype(x_fb.dtype).itemsize)
    num_steps = pl.cdiv(B, bt)   # if bt does not divide B, the tail block is
                                 # padded; padded columns are dropped on write
                                 # back and never mix across batch elements.

    x_map = lambda j: (0, 0, j)
    x_spec = pl.BlockSpec((P, F, bt), x_map)
    if num_steps >= 3:
        # Deeper input pipelining hides DMA jitter on long grids; guarded so a
        # jax without BlockSpec.pipeline_mode still runs with default buffering.
        try:
            x_spec = pl.BlockSpec((P, F, bt), x_map, pipeline_mode=pl.Buffered(3))
        except (AttributeError, TypeError):
            pass

    kernel = partial(
        _pt_scan_kernel,
        inv_postroot=1.0 / float(postroot),
        apply_root=(float(postroot) != 1.0),
        log_space=bool(log_space),
    )

    out = pl.pallas_call(
        kernel,
        out_shape=jax.ShapeDtypeStruct((P, B), x_fb.dtype),
        grid=(num_steps,),
        in_specs=[
            x_spec,                                         # batch-tiled input
            pl.BlockSpec((P, F, 1), lambda j: (0, 0, 0)),   # wn: VMEM-resident
            pl.BlockSpec((P, F, 1), lambda j: (0, 0, 0)),   # bn: VMEM-resident
        ],
        # Output block (P, bt) is lane-dense; P < 8 sublanes are masked on the
        # store, but output traffic is only ~1/F of the input traffic.
        out_specs=pl.BlockSpec((P, bt), lambda j: (0, j)),
        compiler_params=pltpu.CompilerParams(
            # Batch tiles are independent work -> v7x can shard them across its
            # two TensorCores; a no-op on v5e/v6e.
            dimension_semantics=("parallel",),
        ),
    )(x_fb, wn, bn)
    return out


def pt_scan_forward_from_module_layout(x, weights, biases, **kwargs):
    """Compatibility entry matching PtScanNetwork.forward exactly.

    x: (P, B, F) as the PyTorch module expects; returns a list of P (B,) arrays.
    NOTE: this must relayout x in HBM (extra read+write of x).  Prefer emitting
    x as (P, F, B) in the producer and calling pt_scan_forward directly.
    """
    out = pt_scan_forward(jnp.transpose(x, (0, 2, 1)), weights, biases, **kwargs)
    return [out[i] for i in range(out.shape[0])]


def _reference_module(x_pbf, weights, biases, activationscale, postroot):
    # Literal transcription of PtScanNetwork.forward / OneToOneLinear.forward.
    outs = []
    for i in range(x_pbf.shape[0]):
        z = jax.nn.sigmoid(activationscale * (x_pbf[i] * weights[i] + biases[i]))
        outs.append(jnp.prod(z, axis=-1) ** (1.0 / postroot))
    return outs


if __name__ == "__main__":
    pt = [20.0, 30.0, 40.0, 50.0]       # 4 pt working points -> 4 OneToOneLinear nets
    P = len(pt)
    features = 8
    batch = 256                         # two lane-dense grid steps of 128
    activationscale = 2.0

    key = jax.random.PRNGKey(0)
    kx, kw, kb = jax.random.split(key, 3)

    # Producer emits x directly in the kernel-preferred (P, F, B) layout.
    x_fb = jax.random.normal(kx, (P, features, batch), dtype=jnp.float32)
    weights = jax.random.uniform(kw, (P, features), jnp.float32, -1.0, 1.0)
    biases = jax.random.uniform(kb, (P, features), jnp.float32, -0.5, 0.5)

    # Module-layout view (P, B, F); only used by the reference / compat check.
    x_pbf = jnp.transpose(x_fb, (0, 2, 1))

    # 1) fast path, postroot == 1
    out = jax.block_until_ready(
        pt_scan_forward(x_fb, weights, biases,
                        activationscale=activationscale, postroot=1.0))
    ref = _reference_module(x_pbf, weights, biases, activationscale, 1.0)
    assert out.shape == (P, batch)
    for i in range(P):
        assert jnp.allclose(out[i], ref[i], rtol=1e-5, atol=1e-6)

    # 2) postroot != 1 exercises the root finalization on the reduced result
    out_r = jax.block_until_ready(
        pt_scan_forward(x_fb, weights, biases,
                        activationscale=activationscale, postroot=2.0))
    ref_r = _reference_module(x_pbf, weights, biases, activationscale, 2.0)
    for i in range(P):
        assert jnp.allclose(out_r[i], ref_r[i], rtol=1e-5, atol=1e-6)

    # 3) opt-in log-space path (for very large feature counts)
    out_l = jax.block_until_ready(
        pt_scan_forward(x_fb, weights, biases,
                        activationscale=activationscale, postroot=1.0,
                        log_space=True))
    for i in range(P):
        assert jnp.allclose(out_l[i], ref[i], rtol=1e-5, atol=1e-6)

    # 4) module-layout compatibility wrapper returns the same list of (B,) arrays
    outs_list = pt_scan_forward_from_module_layout(
        x_pbf, weights, biases, activationscale=activationscale, postroot=1.0)
    outs_list = [jax.block_until_ready(o) for o in outs_list]
    for i in range(P):
        assert outs_list[i].shape == (batch,)
        assert jnp.allclose(outs_list[i], ref[i], rtol=1e-5, atol=1e-6)

    print("KERNEL_OK")
</pallas_src>

<mosaic_0001>
module attributes {stable_mosaic.version = 11 : i64} {
  func.func @_pt_scan_kernel(%arg0: i32, %arg1: memref<4x8x128xf32, #tpu.memory_space<vmem>>, %arg2: memref<4x8x1xf32, #tpu.memory_space<vmem>>, %arg3: memref<4x8x1xf32, #tpu.memory_space<vmem>>, %arg4: memref<4x128xf32, #tpu.memory_space<vmem>>) attributes {dimension_semantics = [#tpu.dimension_semantics<parallel>], iteration_bounds = array<i64: 2>, scalar_prefetch = 0 : i64, scratch_operands = 0 : i64, tpu.core_type = #tpu.core_type<tc>, window_params = [{transform_indices = @transform_0, window_bounds = array<i64: 4, 8, 128>}, {pipeline_mode = #tpu.pipeline_mode<synchronous>, transform_indices = @transform_1, window_bounds = array<i64: 4, 8, 1>}, {pipeline_mode = #tpu.pipeline_mode<synchronous>, transform_indices = @transform_2, window_bounds = array<i64: 4, 8, 1>}, {transform_indices = @transform_3, window_bounds = array<i64: 4, 128>}]} {
    %c0 = arith.constant 0 : index
    %c0_0 = arith.constant 0 : index
    %c0_1 = arith.constant 0 : index
    %0 = vector.load %arg1[%c0, %c0_0, %c0_1] : memref<4x8x128xf32, #tpu.memory_space<vmem>>, vector<4x8x128xf32>
    %c0_2 = arith.constant 0 : index
    %c0_3 = arith.constant 0 : index
    %c0_4 = arith.constant 0 : index
    %1 = vector.load %arg2[%c0_2, %c0_3, %c0_4] : memref<4x8x1xf32, #tpu.memory_space<vmem>>, vector<4x8x1xf32>
    %2 = vector.broadcast %1 : vector<4x8x1xf32> to vector<4x8x128xf32>
    %3 = arith.mulf %0, %2 : vector<4x8x128xf32>
    %c0_5 = arith.constant 0 : index
    %c0_6 = arith.constant 0 : index
    %c0_7 = arith.constant 0 : index
    %4 = vector.load %arg3[%c0_5, %c0_6, %c0_7] : memref<4x8x1xf32, #tpu.memory_space<vmem>>, vector<4x8x1xf32>
    %5 = vector.broadcast %4 : vector<4x8x1xf32> to vector<4x8x128xf32>
    %6 = arith.addf %3, %5 : vector<4x8x128xf32>
    %7 = math.exp %6 : vector<4x8x128xf32>
    %cst = arith.constant 1.000000e+00 : f32
    %8 = vector.broadcast %cst : f32 to vector<4x8x128xf32>
    %9 = arith.addf %7, %8 : vector<4x8x128xf32>
    %10 = vector.extract_strided_slice %9 {offsets = [0, 0, 0], sizes = [4, 1, 128], strides = [1, 1, 1]} : vector<4x8x128xf32> to vector<4x1x128xf32>
    %11 = vector.shape_cast %10 : vector<4x1x128xf32> to vector<4x128xf32>
    %12 = vector.extract_strided_slice %9 {offsets = [0, 1, 0], sizes = [4, 1, 128], strides = [1, 1, 1]} : vector<4x8x128xf32> to vector<4x1x128xf32>
    %13 = vector.shape_cast %12 : vector<4x1x128xf32> to vector<4x128xf32>
    %14 = arith.mulf %11, %13 : vector<4x128xf32>
    %15 = vector.extract_strided_slice %9 {offsets = [0, 2, 0], sizes = [4, 1, 128], strides = [1, 1, 1]} : vector<4x8x128xf32> to vector<4x1x128xf32>
    %16 = vector.shape_cast %15 : vector<4x1x128xf32> to vector<4x128xf32>
    %17 = arith.mulf %14, %16 : vector<4x128xf32>
    %18 = vector.extract_strided_slice %9 {offsets = [0, 3, 0], sizes = [4, 1, 128], strides = [1, 1, 1]} : vector<4x8x128xf32> to vector<4x1x128xf32>
    %19 = vector.shape_cast %18 : vector<4x1x128xf32> to vector<4x128xf32>
    %20 = arith.mulf %17, %19 : vector<4x128xf32>
    %21 = vector.extract_strided_slice %9 {offsets = [0, 4, 0], sizes = [4, 1, 128], strides = [1, 1, 1]} : vector<4x8x128xf32> to vector<4x1x128xf32>
    %22 = vector.shape_cast %21 : vector<4x1x128xf32> to vector<4x128xf32>
    %23 = arith.mulf %20, %22 : vector<4x128xf32>
    %24 = vector.extract_strided_slice %9 {offsets = [0, 5, 0], sizes = [4, 1, 128], strides = [1, 1, 1]} : vector<4x8x128xf32> to vector<4x1x128xf32>
    %25 = vector.shape_cast %24 : vector<4x1x128xf32> to vector<4x128xf32>
    %26 = arith.mulf %23, %25 : vector<4x128xf32>
    %27 = vector.extract_strided_slice %9 {offsets = [0, 6, 0], sizes = [4, 1, 128], strides = [1, 1, 1]} : vector<4x8x128xf32> to vector<4x1x128xf32>
    %28 = vector.shape_cast %27 : vector<4x1x128xf32> to vector<4x128xf32>
    %29 = arith.mulf %26, %28 : vector<4x128xf32>
    %30 = vector.extract_strided_slice %9 {offsets = [0, 7, 0], sizes = [4, 1, 128], strides = [1, 1, 1]} : vector<4x8x128xf32> to vector<4x1x128xf32>
    %31 = vector.shape_cast %30 : vector<4x1x128xf32> to vector<4x128xf32>
    %32 = arith.mulf %29, %31 : vector<4x128xf32>
    %cst_8 = arith.constant 1.000000e+00 : f32
    %33 = vector.broadcast %cst_8 : f32 to vector<4x128xf32>
    %34 = arith.divf %33, %32 : vector<4x128xf32>
    %c0_9 = arith.constant 0 : index
    %c0_10 = arith.constant 0 : index
    %35 = vector.load %arg4[%c0_9, %c0_10] : memref<4x128xf32, #tpu.memory_space<vmem>>, vector<4x128xf32>
    tpu.vector_store %arg4[%c0_9, %c0_10], %34 {strides = array<i32>} : memref<4x128xf32, #tpu.memory_space<vmem>>, vector<4x128xf32>,
    return
  }
  func.func @transform_0(%arg0: i32) -> (i32, i32, i32) {
    %c0_i32 = arith.constant 0 : i32
    %c0_i32_0 = arith.constant 0 : i32
    %c0_i32_1 = arith.constant 0 : i32
    return %c0_i32, %c0_i32_0, %arg0 : i32, i32, i32
  }
  func.func @transform_1(%arg0: i32) -> (i32, i32, i32) {
    %c0_i32 = arith.constant 0 : i32
    %c0_i32_0 = arith.constant 0 : i32
    %c0_i32_1 = arith.constant 0 : i32
    %c0_i32_2 = arith.constant 0 : i32
    return %c0_i32, %c0_i32_0, %c0_i32_1 : i32, i32, i32
  }
  func.func @transform_2(%arg0: i32) -> (i32, i32, i32) {
    %c0_i32 = arith.constant 0 : i32
    %c0_i32_0 = arith.constant 0 : i32
    %c0_i32_1 = arith.constant 0 : i32
    %c0_i32_2 = arith.constant 0 : i32
    return %c0_i32, %c0_i32_0, %c0_i32_1 : i32, i32, i32
  }
  func.func @transform_3(%arg0: i32) -> (i32, i32) {
    %c0_i32 = arith.constant 0 : i32
    %c0_i32_0 = arith.constant 0 : i32
    return %c0_i32, %arg0 : i32, i32
  }
}

</mosaic_0001>

<bundles_post_ra>
// kernel: tpu_custom_call.1
= control target key start
LH: loop header
LB: loop body
LE: loop exit
PB: predicated region body
PF: predicated region fallthrough
CT: control target
= control target key end

     0   :  { %8 = vsyncpa [#allocation4], 0  ;;  %s759_s0 = inlined_call_operand.vmem [shape: f32[4,8,256], index: 0, kind: input, shape index: {}]   ;;  %s760_s1 = inlined_call_operand.vmem [shape: f32[4,8,1], index: 1, kind: input, shape index: {}]   ;;  %s761_s2 = inlined_call_operand.vmem [shape: f32[4,8,1], index: 2, kind: input, shape index: {}]   ;;  %s762_s3 = inlined_call_operand.hbm [shape: f32[4,256], index: 3, kind: output, shape index: {}]  }
   0x1   :  { %10 = vsyncpa [#allocation4 + $0x1], 0  ;;  %s632_s12 = smov 0   ;;  %s634_s13 = smov 0  }
   0x2   :  { %s636_s14 = smov 0   ;;  %s638_s15 = smov 0  }
   0x3 LB: > { %s477_s16 = sadd.s32 4294967295, %s608_s15   ;;  %s478_s17 = sadd.s32 4294967294, %s608_s15   ;;  %s608_s15 = sphi %s638_s15, %s768_s15   ;;  %s604_s14 = sphi %s636_s14, %s767_s14   ;;  %s600_s13 = sphi %s634_s13, %s766_s13   ;;  %s596_s12 = sphi %s632_s12, %s765_s12  }
   0x4   : > { %s655_s18 = sadd.s32 1, %s608_s15   ;;  %s23_s19 = sadd.s32 1, %s604_s14 }
   0x5   : > { %s20_s20 = ssub.s32 %s608_s15, %s655_s18  ;;  %p30_p0 = scmp.ne.s32.totalorder %s604_s14, %s600_s13 }
   0x6   : > { %p21_p1 = scmp.eq.s32.totalorder %s20_s20, 0  ;;  %p31_p2 = scmp.eq.s32.totalorder %s608_s15, 0 }
   0x7   : > { %p102_p3 = scmp.eq.s32.totalorder %s477_s16, 1  ;;  %p107_p4 = scmp.ne.s32.totalorder %s600_s13, %s596_s12 }
   0x8   : > { %s668_s21 = scalar_select %p21_p1, %s604_s14, %s23_s19  }
   0x9   : > { %p32_p5 = por %p31_p2, %p30_p0  ;;  %p670_p6 = por %p102_p3, %p30_p0 }
   0xa   : > { %p108_p7 = scmp.eq.s32.totalorder %s478_s17, 1  ;;  %p480_p9 = scmp.ge.s32.totalorder %s608_s15, 2 }
   0xc   : > { %p674_p8 = por %p108_p7, %p107_p4  ;;  %130 = sbr.rel (%p480_p9) target bundleno = 23 (0x17), region = 24 }
  0x11   : > { %133 = sbr.rel (!%p32_p5) target bundleno = 23 (0x17), region = 28  ;;  %s135_s24 = sand.u32 (%p32_p5), 1, %s604_s14  }
  0x12   : > { %s482_s25 = sshll.u32 (%p32_p5), %s608_s15, 3  ;;  %s481_s26 = sshll.u32 (%p32_p5), %s135_s24, 5 }
  0x13   : > { %s139_s29 = scalar_lea.vmem (%p32_p5), %s759_s0, %s482_s25  ;;  %s137_s30 = scalar_lea.vmem (%p32_p5), [#allocation2], %s481_s26 }
  0x14   : > { %v174_v0 = vld [vmem:[%s139_s29] sm:$0xff] (%p32_p5)  ;;  %v176_v1 = vld [vmem:[%s139_s29 + $0x10] sm:$0xff] (%p32_p5) }
  0x15   : > { %v178_v2 = vld [vmem:[%s139_s29 + $0x20] sm:$0xff] (%p32_p5)  ;;  %175 = vst [vmem:[%s137_s30] sm:$0xff] (%p32_p5), %v174_v0  ;;  %177 = vst [vmem:[%s137_s30 + $0x8] sm:$0xff] (%p32_p5), %v176_v1  ;;  %v180_v3 = vld [vmem:[%s139_s29 + $0x30] sm:$0xff] (%p32_p5) }
  0x16   : > { %179 = vst [vmem:[%s137_s30 + $0x10] sm:$0xff] %v178_v2  ;;  %181 = vst [vmem:[%s137_s30 + $0x18] sm:$0xff] %v180_v3 }
  0x17 PF: > { %p483_p10 = scmp.ge.s32.totalorder %s608_s15, 1  ;;  %p186_p11 = scmp.lt.s32.totalorder %s608_s15, 3 }
  0x19   : > { %p187_p12 = pnand %p483_p10, %p186_p11 }
  0x1a   : > { %s713_s29 = sand.u32 (!%p187_p12), 1, %s600_s13   ;;  %s487_s6 = sshll.u32 (!%p187_p12), %s477_s16, 6 }
  0x1b   : > { %190 = sbr.rel (%p187_p12) target bundleno = 237 (0xed), region = 66  ;;  %s484_s30 = sshll.u32 (!%p187_p12), %s713_s29, 5 }
  0x1c   : > { %s195_s4 = scalar_lea.vmem (!%p187_p12), [#allocation2], %s484_s30  ;;  %s485_s5 = sshll.u32 (!%p187_p12), %s713_s29, 2 }
  0x1d   : > { %s215_s7 = scalar_lea.vmem (!%p187_p12), [#allocation3], %s485_s5  ;;  %s722_s11 = scalar_lea.hbm (!%p187_p12), %s762_s3, %s487_s6 }
  0x1e   : > { %s413_s8 = sshll.u32 (!%p187_p12), %s215_s7, 4  ;;  %s400_s17 = scalar_lea.sflag (!%p187_p12), [#allocation4], %s713_s29  ;;  %s414_s8 = int_to_ptr.vmem [resolvable:$true] %s413_s8 }
  0x1f   : > { %s548_s19 = scalar_lea.vmem (!%p187_p12), %s414_s8, 64  ;;  %s611_s16 = smov (!%p187_p12), [#allocation3]  }
  0x20   : > { %v221_v4 = vld [vmem:[%s760_s1 + $0x8] sm:$0xff]  ;;  %v220_v5 = vld [vmem:[%s760_s1] sm:$0xff]  ;;  %v610_v6 = vmov 0   ;;  %v222_v7 = vld [vmem:[%s760_s1 + $0x10] sm:$0xff]  ;;  %vm389_vm0 = vcmask 1041409   ;;  %vm392_vm1 = vcmask 1042434   ;;  %p549_p13 = scmp.ne.s32.totalorder %s414_s8, %s548_s19 }
  0x21   : > { %531 = vset.pattern.permute.xlu1 %v610_v6  ;;  %530 = vset.pattern.permute.xlu0 %v610_v6  ;;  %v223_v8 = vld [vmem:[%s760_s1 + $0x18] sm:$0xff]  ;;  %v249_v9 = vld [vmem:[%s761_s2 + $0x8] sm:$0xff]  ;;  %v250_v10 = vld [vmem:[%s761_s2 + $0x10] sm:$0xff]  ;;  %vm395_vm2 = vcmask 1043459   ;;  %s552_s20 = sshll.u32 %s611_s16, 4  ;;  %s553_s20 = int_to_ptr.vmem [resolvable:$false] %s552_s20 }
  0x22   : > { %231 = vperm.xlu0 %530, %v221_v4   ;;  %226 = vperm.xlu1 %531, %v220_v5   ;;  %v248_v11 = vld [vmem:[%s761_s2] sm:$0xff]  ;;  %v251_v12 = vld [vmem:[%s761_s2 + $0x18] sm:$0xff]  ;;  %v217_v15 = vld [vmem:[%s195_s4 + $0x8] sm:$0xff]  ;;  %p550_p0 = pnand %p549_p13, %p670_p6  ;;  %s554_s24 = scalar_lea.vmem %s553_s20, 128 }
  0x23   : > { %v218_v17 = vld [vmem:[%s195_s4 + $0x10] sm:$0xff]  ;;  %v216_v21 = vld [vmem:[%s195_s4] sm:$0xff]  ;;  %v219_v22 = vld [vmem:[%s195_s4 + $0x18] sm:$0xff]  ;;  %p555_p2 = scmp.lt.s32.totalorder %s414_s8, %s553_s20  ;;  %p556_p3 = scmp.lt.s32.totalorder %s554_s24, %s548_s19 }
  0x24   : > { %p551_p1 = pneg %p550_p0 }
  0x25   : > { %p557_p4 = por %p556_p3, %p555_p2 }
  0x26   : > { %236 = vperm.xlu0 %530, %v222_v7   ;;  %241 = vperm.xlu1 %531, %v223_v8  }
  0x27   : > { %p558_p5 = pnand %p557_p4, %p551_p1 }
  0x2a   : > { %259 = vperm.xlu0 %530, %v249_v9   ;;  %264 = vperm.xlu1 %531, %v250_v10  }
  0x2e   : > { %254 = vperm.xlu0 %530, %v248_v11   ;;  %269 = vperm.xlu1 %531, %v251_v12  }
  0x9d   : > { %v232_v13 = vpop.permute.xlu0 %231  ;;  %v227_v14 = vpop.permute.xlu1 %226 }
  0x9e   : > { %v245_v19 = vmul.f32 %v232_v13, %v217_v15  ;;  %v244_v27 = vmul.f32 %v227_v14, %v216_v21 }
  0xa1   : > { %v237_v16 = vpop.permute.xlu0 %236  ;;  %v242_v18 = vpop.permute.xlu1 %241 }
  0xa2   : > { %v246_v20 = vmul.f32 %v237_v16, %v218_v17  ;;  %v247_v28 = vmul.f32 %v242_v18, %v219_v22 }
  0xa5   : > { %v260_v23 = vpop.permute.xlu0 %259  ;;  %v265_v24 = vpop.permute.xlu1 %264 }
  0xa6   : > { %v273_v25 = vadd.f32 %v260_v23, %v245_v19  ;;  %v274_v26 = vadd.f32 %v265_v24, %v246_v20 }
  0xa8   : > { %v278_v29 = vmul.f32 1.442695, %v273_v25  ;;  %v280_v30 = vmul.f32 1.442695, %v274_v26 }
  0xa9   : > { %v255_v31 = vpop.permute.xlu0 %254  ;;  %v270_v32 = vpop.permute.xlu1 %269 }
  0xaa   : > { %532 = vpow2.f32 %v278_v29  ;;  %v272_v33 = vadd.f32 %v255_v31, %v244_v27  ;;  %v275_v34 = vadd.f32 %v270_v32, %v247_v28 }
  0xab   : > { %534 = vpow2.f32 %v280_v30 }
  0xac   : > { %v276_v35 = vmul.f32 1.442695, %v272_v33  ;;  %v282_v36 = vmul.f32 1.442695, %v275_v34 }
  0xae   : > { %536 = vpow2.f32 %v276_v35 }
  0xaf   : > { %538 = vpow2.f32 %v282_v36 }
  0xb7   : > { %v533_v37 = vpop.eup %532 }
  0xb8   : > { %v535_v38 = vpop.eup %534  ;;  %v285_v39 = vadd.f32 1.0, %v533_v37 }
  0xb9   : > { %v286_v40 = vadd.f32 1.0, %v535_v38 }
  0xba   : > { %v293_v41 = vrot.slane %v285_v39, 1  ;;  %v305_v50 = vrot.slane %v285_v39, 2  ;;  %v317_v53 = vrot.slane %v285_v39, 3  ;;  %v329_v61 = vrot.slane %v285_v39, 4 }
  0xbb   : > { %v537_v42 = vpop.eup %536  ;;  %v294_v43 = vrot.slane %v286_v40, 1  ;;  %v306_v51 = vrot.slane %v286_v40, 2  ;;  %v318_v54 = vrot.slane %v286_v40, 3  ;;  %v330_v62 = vrot.slane %v286_v40, 4 }
  0xbc   : > { %v539_v44 = vpop.eup %538  ;;  %v284_v45 = vadd.f32 1.0, %v537_v42  ;;  %v301_v46 = vmul.f32 %v293_v41, %v285_v39  ;;  %v341_v5 = vrot.slane %v285_v39, 5  ;;  %v342_v6 = vrot.slane %v286_v40, 5 }
  0xbd   : > { %v287_v47 = vadd.f32 1.0, %v539_v44  ;;  %v302_v48 = vmul.f32 %v294_v43, %v286_v40  ;;  %v353_v13 = vrot.slane %v285_v39, 6  ;;  %v354_v14 = vrot.slane %v286_v40, 6 }
  0xbe   : > { %v292_v49 = vrot.slane %v284_v45, 1  ;;  %v304_v56 = vrot.slane %v284_v45, 2  ;;  %v313_v57 = vmul.f32 %v305_v50, %v301_v46  ;;  %v316_v0 = vrot.slane %v284_v45, 3 }
  0xbf   : > { %v295_v52 = vrot.slane %v287_v47, 1  ;;  %v314_v58 = vmul.f32 %v306_v51, %v302_v48  ;;  %v307_v60 = vrot.slane %v287_v47, 2  ;;  %v319_v4 = vrot.slane %v287_v47, 3 }
  0xc0   : > { %v300_v55 = vmul.f32 %v292_v49, %v284_v45  ;;  %v325_v1 = vmul.f32 %v317_v53, %v313_v57  ;;  %v328_v8 = vrot.slane %v284_v45, 4  ;;  %v331_v12 = vrot.slane %v287_v47, 4 }
  0xc1   : > { %v303_v59 = vmul.f32 %v295_v52, %v287_v47  ;;  %v326_v2 = vmul.f32 %v318_v54, %v314_v58  ;;  %v340_v16 = vrot.slane %v284_v45, 5  ;;  %v352_v19 = vrot.slane %v284_v45, 6 }
  0xc2   : > { %v312_v63 = vmul.f32 %v304_v56, %v300_v55  ;;  %v337_v9 = vmul.f32 %v329_v61, %v325_v1  ;;  %v343_v21 = vrot.slane %v287_v47, 5  ;;  %v365_v22 = vrot.slane %v285_v39, 7 }
  0xc3   : > { %v315_v3 = vmul.f32 %v307_v60, %v303_v59  ;;  %v338_v10 = vmul.f32 %v330_v62, %v326_v2  ;;  %v366_v26 = vrot.slane %v286_v40, 7  ;;  %v355_v28 = vrot.slane %v287_v47, 6 }
  0xc4   : > { %v324_v7 = vmul.f32 %v316_v0, %v312_v63  ;;  %v349_v17 = vmul.f32 %v341_v5, %v337_v9  ;;  %v364_v30 = vrot.slane %v284_v45, 7  ;;  %v367_v34 = vrot.slane %v287_v47, 7 }
  0xc5   : > { %v327_v11 = vmul.f32 %v319_v4, %v315_v3  ;;  %v350_v18 = vmul.f32 %v342_v6, %v338_v10 }
  0xc6   : > { %v336_v15 = vmul.f32 %v328_v8, %v324_v7  ;;  %v361_v24 = vmul.f32 %v353_v13, %v349_v17 }
  0xc7   : > { %v339_v20 = vmul.f32 %v331_v12, %v327_v11  ;;  %v362_v25 = vmul.f32 %v354_v14, %v350_v18 }
  0xc8   : > { %v348_v23 = vmul.f32 %v340_v16, %v336_v15  ;;  %v373_v31 = vmul.f32 %v365_v22, %v361_v24 }
  0xc9   : > { %v351_v27 = vmul.f32 %v343_v21, %v339_v20  ;;  %v374_v32 = vmul.f32 %v366_v26, %v362_v25 }
  0xca   : > { %v360_v29 = vmul.f32 %v352_v19, %v348_v23  ;;  %540 = vrcp.f32 %v373_v31 }
  0xcb   : > { %v363_v33 = vmul.f32 %v355_v28, %v351_v27  ;;  %542 = vrcp.f32 %v374_v32 }
  0xcc   : > { %v372_v35 = vmul.f32 %v364_v30, %v360_v29 }
  0xcd   : > { %v375_v36 = vmul.f32 %v367_v34, %v363_v33 }
  0xce   : > { %544 = vrcp.f32 %v372_v35 }
  0xcf   : > { %546 = vrcp.f32 %v375_v36 }
  0xd7   : > { %v541_v37 = vpop.eup %540 }
  0xd8   : > { %v543_v38 = vpop.eup %542  ;;  %v388_v39 = vrot.slane %v541_v37, 7 }
  0xd9   : > { %v391_v41 = vrot.slane %v543_v38, 6 }
  0xdb   : > { %v545_v40 = vpop.eup %544 }
  0xdc   : > { %v547_v42 = vpop.eup %546  ;;  %v390_v43 = vsel %vm389_vm0, %v388_v39, %v545_v40 }
  0xdd   : > { %v393_v44 = vsel %vm392_vm1, %v391_v41, %v390_v43  ;;  %v394_v45 = vrot.slane %v547_v42, 5 }
  0xdf   : > { %v396_v46 = vsel %vm395_vm2, %v394_v45, %v393_v44 }
  0xe0   : > { %398 = vst [vmem:[%s215_s7] sm:$0xf] %v396_v46 }
  0xe1   : > { %561 = shalt.err (!%p558_p5)
}
  0xe2   : > { %s562_s25 = scalar_lea.hbm %s722_s11, 64  ;;  %s566_s28 = scalar_lea.hbm %s762_s3, 128 }
  0xe3   : > { %p563_p7 = scmp.ne.s32.totalorder %s722_s11, %s562_s25  ;;  %p567_p12 = scmp.lt.s32.totalorder %s722_s11, %s762_s3 }
  0xe4   : > { %p568_p13 = scmp.lt.s32.totalorder %s566_s28, %s562_s25 }
  0xe5   : > { %p564_p10 = pnand %p563_p7, %p670_p6 }
  0xe6   : > { %p569_p0 = por %p568_p13, %p567_p12 }
  0xe7   : > { %p565_p11 = pneg %p564_p10 }
  0xe9   : > { %p570_p1 = pnand %p569_p0, %p565_p11 }
  0xeb   : > { %573 = shalt.err (!%p570_p1)
}
  0xec   : > { %490 = dma.vmem_to_hbm [thread:$0]  (%p670_p6), %s414_s8, 64, %s722_s11, %s400_s17  }
  0xed PF: > { %s425_s4 = sand.u32 1, %s596_s12   ;;  %p493_p2 = pnand %p480_p9, %p674_p8 }
  0xee   : > { %s426_s5 = scalar_lea.sflag [#allocation4], %s425_s4 }
  0xef   : > { %p494_p3 = pneg %p493_p2 }
  0xf1   : > { %591 = dma.done.wait (%p494_p3), %s426_s5, 64  }
  0xf2   : > { %593 = vsyncadd (%p494_p3), %s426_s5, 4294967232  ;;  %p13_p4 = scmp.ge.s32.totalorder %s655_s18, 4   ;;  %s765_s12 = smov %s600_s13 }
  0xf3   : > { %s766_s13 = smov %s604_s14  ;;  %s767_s14 = smov %s668_s21 }
  0xf4   : > { %s768_s15 = smov %s655_s18  ;;  %15 = sbr.rel (!%p13_p4) target bundleno = 3 (0x3), region = 110 }
  0xf9   :  { %431 = vsyncpa [#allocation4], 1 }
  0xfa   :  { %433 = vsyncpa [#allocation4 + $0x1], 1 }

</bundles_post_ra>
